<compile_context>
chip_gen: v6e
topology: v6e:2x2x1
jax: 0.10.0
libtpu: 0.0.40
codegen_flags: <defaults>
</compile_context>

<pallas_src>
import jax
import jax.numpy as jnp
import numpy as np
from jax.experimental import pallas as pl
from jax.experimental.pallas import tpu as pltpu


# ---------------------------------------------------------------------------
# Kernels
# ---------------------------------------------------------------------------

def _disc_bcast_kernel(bias_ref, rhs_pos_ref, rhs_neg_ref, pos_ref, neg_ref, out_ref):
    """Broadcast-context path (g_repr is a single row -> v is shared by every row).

    bias_ref:    (1,)     f32 SMEM scalar
    rhs_pos_ref: (nf, 2)  f32 VMEM, column 0 = v, column 1 = 0   (resident)
    rhs_neg_ref: (nf, 2)  f32 VMEM, column 0 = 0, column 1 = v   (resident)
    pos_ref:     (tm, nf) node embeddings, positive pairing
    neg_ref:     (tm, nf) node embeddings, negative pairing
    out_ref:     (tm, 2)  f32   [:,0] = sc_1, [:,1] = sc_2
    """
    pos = pos_ref[...]
    neg = neg_ref[...]
    if pos.dtype != jnp.float32:          # static dtype check; no-op for f32 inputs
        pos = pos.astype(jnp.float32)
    if neg.dtype != jnp.float32:
        neg = neg.astype(jnp.float32)

    # Row-wise dot products on the MXU: one (tm, 2) result, single full-tile store.
    acc = jnp.dot(pos, rhs_pos_ref[...], preferred_element_type=jnp.float32,
                  precision=jax.lax.Precision.HIGHEST)
    acc = acc + jnp.dot(neg, rhs_neg_ref[...], preferred_element_type=jnp.float32,
                        precision=jax.lax.Precision.HIGHEST)
    out_ref[...] = (acc + bias_ref[0]).astype(out_ref.dtype)


def _disc_rowwise_kernel(bias_ref, v_ref, pos_ref, neg_ref, out_ref):
    """Fallback for a per-row context (g_repr already has N rows: expand_as is a no-op).

    v varies per row, so the fixed-RHS MXU trick does not apply; use VPU mul + lane reduce.
    """
    b = bias_ref[0]
    v = v_ref[...]
    pos = pos_ref[...].astype(jnp.float32)
    neg = neg_ref[...].astype(jnp.float32)
    sc1 = jnp.sum(pos * v, axis=-1, keepdims=True) + b
    sc2 = jnp.sum(neg * v, axis=-1, keepdims=True) + b
    out_ref[:, 0:1] = sc1.astype(out_ref.dtype)
    out_ref[:, 1:2] = sc2.astype(out_ref.dtype)


# ---------------------------------------------------------------------------
# Wrapper
# ---------------------------------------------------------------------------

def _round_up(x, m):
    return ((x + m - 1) // m) * m


def _choose_block_rows(n, nf, itemsize):
    """Row-tile size from real (lane-padded) VMEM bytes, targeting >= 8 grid steps."""
    nf_lanes = _round_up(max(nf, 1), 128)
    # Double-buffered bytes per tile row: 2 input tiles + 1 lane-padded output tile.
    per_row = 2 * (2 * nf_lanes * itemsize + 128 * 4)
    budget = 20 * 1024 * 1024            # fits v7x's 32 MiB scoped VMEM with headroom
    tm_max = max(8, (budget // per_row) // 8 * 8)
    # Keep >= ~8 grid steps when possible so ("parallel",) spreads tiles over both TCs.
    tm_target = _round_up(pl.cdiv(n, 8), 8)
    return int(min(tm_max, max(8, tm_target), _round_up(n, 8)))


def discriminator_forward(g_repr, g_pos, g_neg, weight, bias, *, block_rows=None):
    """g_repr: (nf,), (1, nf) or (N, nf); g_pos/g_neg: (N, nf); weight: (nf, nf); bias: scalar."""
    g_pos = jnp.asarray(g_pos)
    g_neg = jnp.asarray(g_neg)
    N, nf = g_pos.shape
    assert g_neg.shape == (N, nf)

    w = jnp.asarray(weight, jnp.float32).reshape(nf, nf)
    b = jnp.asarray(bias, jnp.float32).reshape(1)          # (1,) SMEM scalar

    g_repr = jnp.asarray(g_repr, jnp.float32)
    if g_repr.ndim == 1:
        g_repr = g_repr[None, :]

    # Hoisted context projection v = c_x @ W^T: a tiny matvec for the intended single-row
    # g_repr.  W and the (N, nf) broadcast never enter the kernel.
    v = jnp.dot(g_repr, w.T, precision=jax.lax.Precision.HIGHEST)   # (R, nf), R in {1, N}
    R = v.shape[0]
    assert R in (1, N), "g_repr must be broadcastable (expand_as) to g_pos"

    itemsize = jnp.dtype(g_pos.dtype).itemsize
    if block_rows is not None:
        tm = max(8, _round_up(int(block_rows), 8))          # (8, 128) sublane rule
        tm = min(tm, _round_up(N, 8))
    else:
        tm = _choose_block_rows(N, nf, itemsize)

    grid = (pl.cdiv(N, tm),)             # ragged last block: Pallas masks the output write
    row_spec = pl.BlockSpec((tm, nf), lambda i: (i, 0))
    out_spec = pl.BlockSpec((tm, 2), lambda i: (i, 0))
    smem_spec = pl.BlockSpec(memory_space=pltpu.MemorySpace.SMEM)

    cost = pl.CostEstimate(
        flops=8 * N * nf,
        transcendentals=0,
        bytes_accessed=2 * N * nf * itemsize + N * 2 * 4 + 4 * nf * 4,
    )
    cparams = pltpu.CompilerParams(
        dimension_semantics=("parallel",),                  # megacore split on v7x
        vmem_limit_bytes=32 * 1024 * 1024,
    )

    if R == 1:
        # (nf, 2) RHS tiles: v in column 0 (positive dot) / column 1 (negative dot).
        v_col = v.reshape(nf, 1)
        zeros = jnp.zeros((nf, 1), jnp.float32)
        rhs_pos = jnp.concatenate([v_col, zeros], axis=1)   # (nf, 2)
        rhs_neg = jnp.concatenate([zeros, v_col], axis=1)   # (nf, 2)
        rhs_spec = pl.BlockSpec((nf, 2), lambda i: (0, 0))  # resident across the grid
        out = pl.pallas_call(
            _disc_bcast_kernel,
            out_shape=jax.ShapeDtypeStruct((N, 2), jnp.float32),
            grid=grid,
            in_specs=[smem_spec, rhs_spec, rhs_spec, row_spec, row_spec],
            out_specs=out_spec,
            compiler_params=cparams,
            cost_estimate=cost,
        )(b, rhs_pos, rhs_neg, g_pos, g_neg)
    else:
        v_spec = pl.BlockSpec((tm, nf), lambda i: (i, 0))   # per-row context
        out = pl.pallas_call(
            _disc_rowwise_kernel,
            out_shape=jax.ShapeDtypeStruct((N, 2), jnp.float32),
            grid=grid,
            in_specs=[smem_spec, v_spec, row_spec, row_spec],
            out_specs=out_spec,
            compiler_params=cparams,
            cost_estimate=cost,
        )(b, v, g_pos, g_neg)

    return out


# ---------------------------------------------------------------------------
# Reference + demo
# ---------------------------------------------------------------------------

def _init_params(nf, key):
    # nn.Bilinear weight shape (1, nf, nf); xavier_uniform_ with fan_in = fan_out = nf.
    bound = np.sqrt(6.0 / (nf + nf))
    w = jax.random.uniform(key, (nf, nf), jnp.float32, minval=-bound, maxval=bound)
    b = jnp.zeros((), jnp.float32)   # bias.fill_(0.0)
    return w, b


def _reference(g_repr, g_pos, g_neg, w, b):
    c_x = jnp.broadcast_to(jnp.reshape(g_repr, (-1, g_pos.shape[1])), g_pos.shape)
    t = jnp.dot(c_x, w.T, precision=jax.lax.Precision.HIGHEST)
    sc1 = jnp.sum(g_pos * t, axis=-1, keepdims=True) + b
    sc2 = jnp.sum(g_neg * t, axis=-1, keepdims=True) + b
    return jnp.concatenate([sc1, sc2], axis=1)


if __name__ == "__main__":
    key = jax.random.PRNGKey(0)
    k_w, k_r, k_p, k_n = jax.random.split(key, 4)

    # Small shapes consistent with the module: nf features, N graph nodes.
    N, nf = 8, 32
    weight, bias = _init_params(nf, k_w)
    g_repr = jax.random.normal(k_r, (1, nf), jnp.float32)    # source-graph summary (broadcast)
    g_pos = jax.random.normal(k_p, (N, nf), jnp.float32)     # positive augmentation
    g_neg = jax.random.normal(k_n, (N, nf), jnp.float32)     # negative augmentation

    logits = jax.block_until_ready(discriminator_forward(g_repr, g_pos, g_neg, weight, bias))
    ref = _reference(g_repr, g_pos, g_neg, weight, bias)
    np.testing.assert_allclose(np.asarray(logits), np.asarray(ref), rtol=1e-4, atol=1e-4)

    # Second check: ragged cdiv grid (300 rows, 128-row tiles -> 3 blocks, last one partial).
    N2 = 300
    k_p2, k_n2 = jax.random.split(k_p)
    g_pos2 = jax.random.normal(k_p2, (N2, nf), jnp.float32)
    g_neg2 = jax.random.normal(k_n2, (N2, nf), jnp.float32)
    logits2 = jax.block_until_ready(
        discriminator_forward(g_repr, g_pos2, g_neg2, weight, bias, block_rows=128)
    )
    ref2 = _reference(g_repr, g_pos2, g_neg2, weight, bias)
    np.testing.assert_allclose(np.asarray(logits2), np.asarray(ref2), rtol=1e-4, atol=1e-4)

    # Third check: per-row g_repr (expand_as is a no-op) exercises the rowwise fallback.
    N3 = 16
    k_r3, k_p3, k_n3 = jax.random.split(k_n, 3)
    g_repr3 = jax.random.normal(k_r3, (N3, nf), jnp.float32)
    g_pos3 = jax.random.normal(k_p3, (N3, nf), jnp.float32)
    g_neg3 = jax.random.normal(k_n3, (N3, nf), jnp.float32)
    logits3 = jax.block_until_ready(
        discriminator_forward(g_repr3, g_pos3, g_neg3, weight, bias)
    )
    ref3 = _reference(g_repr3, g_pos3, g_neg3, weight, bias)
    np.testing.assert_allclose(np.asarray(logits3), np.asarray(ref3), rtol=1e-4, atol=1e-4)

    print("KERNEL_OK")
</pallas_src>

<mosaic_0001>
module attributes {stable_mosaic.version = 11 : i64} {
  func.func @_disc_bcast_kernel(%arg0: i32, %arg1: memref<1xf32, #tpu.memory_space<smem>>, %arg2: memref<32x2xf32, #tpu.memory_space<vmem>>, %arg3: memref<32x2xf32, #tpu.memory_space<vmem>>, %arg4: memref<8x32xf32, #tpu.memory_space<vmem>>, %arg5: memref<8x32xf32, #tpu.memory_space<vmem>>, %arg6: memref<8x2xf32, #tpu.memory_space<vmem>>) attributes {dimension_semantics = [#tpu.dimension_semantics<parallel>], iteration_bounds = array<i64: 1>, scalar_prefetch = 0 : i64, scratch_operands = 0 : i64, tpu.core_type = #tpu.core_type<tc>, window_params = [{transform_indices = @transform_0, window_bounds = array<i64: 1>}, {pipeline_mode = #tpu.pipeline_mode<synchronous>, transform_indices = @transform_1, window_bounds = array<i64: 32, 2>}, {pipeline_mode = #tpu.pipeline_mode<synchronous>, transform_indices = @transform_2, window_bounds = array<i64: 32, 2>}, {transform_indices = @transform_3, window_bounds = array<i64: 8, 32>}, {transform_indices = @transform_4, window_bounds = array<i64: 8, 32>}, {transform_indices = @transform_5, window_bounds = array<i64: 8, 2>}]} {
    %c0 = arith.constant 0 : index
    %c0_0 = arith.constant 0 : index
    %0 = vector.load %arg4[%c0, %c0_0] : memref<8x32xf32, #tpu.memory_space<vmem>>, vector<8x32xf32>
    %c0_1 = arith.constant 0 : index
    %c0_2 = arith.constant 0 : index
    %1 = vector.load %arg5[%c0_1, %c0_2] : memref<8x32xf32, #tpu.memory_space<vmem>>, vector<8x32xf32>
    %c0_3 = arith.constant 0 : index
    %c0_4 = arith.constant 0 : index
    %2 = vector.load %arg2[%c0_3, %c0_4] : memref<32x2xf32, #tpu.memory_space<vmem>>, vector<32x2xf32>
    %cst = arith.constant dense<0.000000e+00> : vector<8x2xf32>
    %3 = tpu.matmul %0, %2, %cst {dimension_numbers = #tpu.dot_dimension_numbers<[1], [0], [0], [1], [0, 0, 1, 1], [], []>, precision = #tpu.contract_precision<fp32>} : vector<8x32xf32>, vector<32x2xf32>, vector<8x2xf32> -> vector<8x2xf32>
    %c0_5 = arith.constant 0 : index
    %c0_6 = arith.constant 0 : index
    %4 = vector.load %arg3[%c0_5, %c0_6] : memref<32x2xf32, #tpu.memory_space<vmem>>, vector<32x2xf32>
    %cst_7 = arith.constant dense<0.000000e+00> : vector<8x2xf32>
    %5 = tpu.matmul %1, %4, %cst_7 {dimension_numbers = #tpu.dot_dimension_numbers<[1], [0], [0], [1], [0, 0, 1, 1], [], []>, precision = #tpu.contract_precision<fp32>} : vector<8x32xf32>, vector<32x2xf32>, vector<8x2xf32> -> vector<8x2xf32>
    %6 = arith.addf %3, %5 : vector<8x2xf32>
    %c0_8 = arith.constant 0 : index
    %7 = memref.load %arg1[%c0_8] : memref<1xf32, #tpu.memory_space<smem>>
    %8 = vector.broadcast %7 : f32 to vector<8x2xf32>
    %9 = arith.addf %6, %8 : vector<8x2xf32>
    %c0_9 = arith.constant 0 : index
    %c0_10 = arith.constant 0 : index
    %10 = vector.load %arg6[%c0_9, %c0_10] : memref<8x2xf32, #tpu.memory_space<vmem>>, vector<8x2xf32>
    tpu.vector_store %arg6[%c0_9, %c0_10], %9 {strides = array<i32>} : memref<8x2xf32, #tpu.memory_space<vmem>>, vector<8x2xf32>,
    return
  }
  func.func @transform_0(%arg0: i32) -> i32 {
    %c0_i32 = arith.constant 0 : i32
    %c0_i32_0 = arith.constant 0 : i32
    return %c0_i32 : i32
  }
  func.func @transform_1(%arg0: i32) -> (i32, i32) {
    %c0_i32 = arith.constant 0 : i32
    %c0_i32_0 = arith.constant 0 : i32
    %c0_i32_1 = arith.constant 0 : i32
    return %c0_i32, %c0_i32_0 : i32, i32
  }
  func.func @transform_2(%arg0: i32) -> (i32, i32) {
    %c0_i32 = arith.constant 0 : i32
    %c0_i32_0 = arith.constant 0 : i32
    %c0_i32_1 = arith.constant 0 : i32
    return %c0_i32, %c0_i32_0 : i32, i32
  }
  func.func @transform_3(%arg0: i32) -> (i32, i32) {
    %c0_i32 = arith.constant 0 : i32
    %c0_i32_0 = arith.constant 0 : i32
    return %arg0, %c0_i32 : i32, i32
  }
  func.func @transform_4(%arg0: i32) -> (i32, i32) {
    %c0_i32 = arith.constant 0 : i32
    %c0_i32_0 = arith.constant 0 : i32
    return %arg0, %c0_i32 : i32, i32
  }
  func.func @transform_5(%arg0: i32) -> (i32, i32) {
    %c0_i32 = arith.constant 0 : i32
    %c0_i32_0 = arith.constant 0 : i32
    return %arg0, %c0_i32 : i32, i32
  }
}

</mosaic_0001>

<bundles_post_ra>
// kernel: tpu_custom_call.1
= control target key start
LH: loop header
LB: loop body
LE: loop exit
PB: predicated region body
PF: predicated region fallthrough
CT: control target
= control target key end

     0   :  { %vm31_vm0 = vcmask 261120   ;;  %v1211_v0 = vmov 0.0   ;;  %vm1212_vm1 = vmmov 0   ;;  %vm1011_vm2 = vcmask 15360   ;;  %s1470_s2 = inlined_call_operand.vmem [shape: f32[32,2], index: 2, kind: input, shape index: {}]   ;;  %s1471_s4 = inlined_call_operand.vmem [shape: f32[8,32], index: 4, kind: input, shape index: {}]   ;;  %s1472_s3 = inlined_call_operand.vmem [shape: f32[8,32], index: 3, kind: input, shape index: {}]   ;;  %s1473_s1 = inlined_call_operand.vmem [shape: f32[32,2], index: 1, kind: input, shape index: {}]   ;;  %s1474_s0 = inlined_call_operand.<no memory space> [shape: f32[1], index: 0, kind: input, shape index: {}]   ;;  %s1475_s5 = inlined_call_operand.vmem [shape: f32[8,2], index: 5, kind: output, shape index: {}]  }
   0x1   :  { %1077 = vmatprep.subr.mxu0 %v1211_v0  ;;  %v30_v1 = vld [vmem:[%s1470_s2 + $0x18] sm:$0xff]  ;;  %v29_v2 = vld [vmem:[%s1470_s2 + $0x10] sm:$0xff]  ;;  %v28_v3 = vld [vmem:[%s1470_s2 + $0x8] sm:$0xff]  ;;  %1088 = vmatprep.subr.mxu1 %v1211_v0 }
   0x2   :  { %v1254_v4 = vand.u32 4294901760, %v30_v1  ;;  %v1256_v5 = vand.u32 4294901760, %v29_v2  ;;  %v1258_v6 = vand.u32 4294901760, %v28_v3  ;;  %v27_v7 = vld [vmem:[%s1470_s2] sm:$0xff]  ;;  %1085 = vmatprep.mubr.msk.f32.mxu0 %vm1212_vm1, %v1211_v0  ;;  %1096 = vmatprep.mubr.msk.f32.mxu1 %vm1212_vm1, %v1211_v0  ;;  %v26_v34 = vld [vmem:[%s1473_s1 + $0x18] sm:$0xff]  ;;  %v25_v35 = vld [vmem:[%s1473_s1 + $0x10] sm:$0xff] }
   0x3   :  { %v22_v8 = vld [vmem:[%s1471_s4] sm:$0xff]  ;;  %v1270_v9 = vand.u32 4294901760, %v27_v7  ;;  %v1335_v37 = vand.u32 4294901760, %v26_v34  ;;  %v24_v38 = vld [vmem:[%s1473_s1 + $0x8] sm:$0xff]  ;;  %v1343_v39 = vand.u32 4294901760, %v25_v35 }
   0x4   :  { %v33_v10 = vsel %vm31_vm0, %v22_v8, 0  ;;  %1078 = vmatpush3.msra.mxu0 %v1254_v4  ;;  %v140_v11 = vsub.f32 %v30_v1, %v1254_v4  ;;  %v1278_v13 = vsub.f32 %v29_v2, %v1256_v5  ;;  %v1282_v14 = vsub.f32 %v28_v3, %v1258_v6  ;;  %v21_v32 = vld [vmem:[%s1472_s3] sm:$0xff] }
   0x5   :  { %v1275_v12 = vand.u32 4294901760, %v33_v10  ;;  %1079 = vmatprep.subr.mxu0 %v1211_v0  ;;  %v1285_v15 = vsub.f32 %v27_v7, %v1270_v9  ;;  %v521_v33 = vsel %vm31_vm0, %v21_v32, 0  ;;  %v23_v40 = vld [vmem:[%s1473_s1] sm:$0xff]  ;;  %v1352_v41 = vsub.f32 %v26_v34, %v1335_v37 }
   0x6   :  { %1080 = vmatpush3.msra.mxu0 %v1256_v5  ;;  %v141_v16 = vand.u32 4294901760, %v140_v11  ;;  %v148_v18 = vand.u32 4294901760, %v1278_v13  ;;  %v155_v19 = vand.u32 4294901760, %v1282_v14  ;;  %v1331_v36 = vand.u32 4294901760, %v521_v33 }
   0x7   :  { %v1289_v17 = vsub.f32 %v33_v10, %v1275_v12  ;;  %1081 = vmatprep.subr.mxu0 %v1211_v0  ;;  %v162_v20 = vand.u32 4294901760, %v1285_v15  ;;  %v1354_v42 = vand.u32 4294901760, %v24_v38  ;;  %v1365_v44 = vsub.f32 %v25_v35, %v1343_v39 }
   0x8   :  { %1082 = vmatpush3.msra.mxu0 %v1258_v6  ;;  %v142_v21 = vsub.f32 %v140_v11, %v141_v16  ;;  %v149_v23 = vsub.f32 %v1278_v13, %v148_v18  ;;  %v156_v24 = vsub.f32 %v1282_v14, %v155_v19  ;;  %v1357_v43 = vsub.f32 %v521_v33, %v1331_v36 }
   0x9   :  { %v106_v22 = vand.u32 4294901760, %v1289_v17  ;;  %1083 = vmatprep.subr.mxu0 %v1211_v0  ;;  %v163_v28 = vsub.f32 %v1285_v15, %v162_v20  ;;  %v1367_v45 = vand.u32 4294901760, %v23_v40  ;;  %v1374_v46 = vsub.f32 %v24_v38, %v1354_v42 }
   0xa   :  { %1084 = vmatpush3.msra.mxu0 %v1270_v9  ;;  %v143_v25 = vand.u32 4294901760, %v142_v21  ;;  %v150_v27 = vand.u32 4294901760, %v149_v23  ;;  %v157_v30 = vand.u32 4294901760, %v156_v24  ;;  %v629_v47 = vand.u32 4294901760, %v1352_v41 }
   0xb   :  { %v107_v26 = vsub.f32 %v1289_v17, %v106_v22  ;;  %1099 = vmatprep.subr.mxu0 %v1211_v0  ;;  %v164_v31 = vand.u32 4294901760, %v163_v28  ;;  %v594_v48 = vand.u32 4294901760, %v1357_v43  ;;  %v1385_v49 = vsub.f32 %v23_v40, %v1367_v45 }
   0xc   :  { %1089 = vmatpush3.msra.mxu1 %v143_v25  ;;  %v636_v50 = vand.u32 4294901760, %v1365_v44  ;;  %v630_v51 = vsub.f32 %v1352_v41, %v629_v47  ;;  %v643_v53 = vand.u32 4294901760, %v1374_v46  ;;  %v1009_v32 = vstv %s1474_s0 }
   0xd   :  { %v108_v29 = vand.u32 4294901760, %v107_v26  ;;  %1090 = vmatprep.subr.mxu1 %v1211_v0  ;;  %v595_v52 = vsub.f32 %v1357_v43, %v594_v48  ;;  %v650_v55 = vand.u32 4294901760, %v1385_v49 }
   0xe   :  { %1091 = vmatpush3.msra.mxu1 %v150_v27  ;;  %v637_v54 = vsub.f32 %v1365_v44, %v636_v50  ;;  %v631_v56 = vand.u32 4294901760, %v630_v51  ;;  %v644_v58 = vsub.f32 %v1374_v46, %v643_v53 }
   0xf   :  { %1086 = vmatmul.mubr.f32.vlgmr.msra.gmra.mxu0 %v108_v29  ;;  %1092 = vmatprep.subr.mxu1 %v1211_v0  ;;  %v596_v57 = vand.u32 4294901760, %v595_v52  ;;  %v651_v60 = vsub.f32 %v1385_v49, %v650_v55 }
  0x10   :  { %1100 = vmatpush3.msra.mxu0 %v140_v11  ;;  %1093 = vmatpush3.msra.mxu1 %v157_v30  ;;  %v638_v59 = vand.u32 4294901760, %v637_v54  ;;  %v645_v61 = vand.u32 4294901760, %v644_v58 }
  0x11   :  { %1101 = vmatprep.subr.mxu0 %v1211_v0  ;;  %1094 = vmatprep.subr.mxu1 %v1211_v0  ;;  %v652_v62 = vand.u32 4294901760, %v651_v60 }
  0x12   :  { %1102 = vmatpush3.msra.mxu0 %v1278_v13  ;;  %1095 = vmatpush3.msra.mxu1 %v164_v31 }
  0x13   :  { %1103 = vmatprep.subr.mxu0 %v1211_v0  ;;  %1097 = vmatmul.mubr.f32.vlgmr.msra.gmra.mxu1 %v1275_v12 }
  0x14   :  { %1104 = vmatpush3.msra.mxu0 %v1282_v14  ;;  %1110 = vmatprep.subr.mxu1 %v1211_v0 }
  0x15   :  { %1105 = vmatprep.subr.mxu0 %v1211_v0  ;;  %1107 = vmatprep.mubr.msk.f32.mxu0 %vm1212_vm1, %v1211_v0 }
  0x16   :  { %1106 = vmatpush3.msra.mxu0 %v1285_v15  ;;  %1111 = vmatpush3.msra.mxu1 %v1254_v4 }
  0x17   :  { %1108 = vmatmul.mubr.f32.vlgmr.msra.gmra.mxu0 %v1289_v17  ;;  %1112 = vmatprep.subr.mxu1 %v1211_v0 }
  0x18   :  { %1121 = vmatprep.subr.mxu0 %v1211_v0  ;;  %1113 = vmatpush3.msra.mxu1 %v1256_v5 }
  0x19   :  { %1122 = vmatpush3.msra.mxu0 %v141_v16  ;;  %1114 = vmatprep.subr.mxu1 %v1211_v0 }
  0x1a   :  { %1123 = vmatprep.subr.mxu0 %v1211_v0  ;;  %1115 = vmatpush3.msra.mxu1 %v1258_v6 }
  0x1b   :  { %1124 = vmatpush3.msra.mxu0 %v148_v18  ;;  %1116 = vmatprep.subr.mxu1 %v1211_v0 }
  0x1c   :  { %1125 = vmatprep.subr.mxu0 %v1211_v0  ;;  %1117 = vmatpush3.msra.mxu1 %v1270_v9 }
  0x1d   :  { %1118 = vmatprep.mubr.msk.f32.mxu1 %vm1212_vm1, %v1211_v0  ;;  %1126 = vmatpush3.msra.mxu0 %v155_v19 }
  0x1e   :  { %1119 = vmatmul.mubr.f32.vlgmr.msra.gmra.mxu1 %v106_v22  ;;  %1127 = vmatprep.subr.mxu0 %v1211_v0 }
  0x1f   :  { %1132 = vmatprep.subr.mxu1 %v1211_v0  ;;  %1128 = vmatpush3.msra.mxu0 %v162_v20 }
  0x20   :  { %1129 = vmatprep.mubr.msk.f32.mxu0 %vm1212_vm1, %v1211_v0  ;;  %1133 = vmatpush3.msra.mxu1 %v1254_v4 }
  0x21   :  { %1130 = vmatmul.mubr.f32.vlgmr.msra.gmra.mxu0 %v1275_v12  ;;  %1134 = vmatprep.subr.mxu1 %v1211_v0 }
  0x22   :  { %1143 = vmatprep.subr.mxu0 %v1211_v0  ;;  %1135 = vmatpush3.msra.mxu1 %v1256_v5 }
  0x23   :  { %1144 = vmatpush3.msra.mxu0 %v1335_v37  ;;  %1136 = vmatprep.subr.mxu1 %v1211_v0 }
  0x24   :  { %1145 = vmatprep.subr.mxu0 %v1211_v0  ;;  %1137 = vmatpush3.msra.mxu1 %v1258_v6 }
  0x25   :  { %1146 = vmatpush3.msra.mxu0 %v1343_v39  ;;  %1138 = vmatprep.subr.mxu1 %v1211_v0 }
  0x26   :  { %1147 = vmatprep.subr.mxu0 %v1211_v0  ;;  %1139 = vmatpush3.msra.mxu1 %v1270_v9 }
  0x27   :  { %1140 = vmatprep.mubr.msk.f32.mxu1 %vm1212_vm1, %v1211_v0  ;;  %1148 = vmatpush3.msra.mxu0 %v1354_v42 }
  0x28   :  { %1141 = vmatmul.mubr.f32.vlgmr.msra.gmra.mxu1 %v1275_v12  ;;  %1149 = vmatprep.subr.mxu0 %v1211_v0 }
  0x29   :  { %1154 = vmatprep.subr.mxu1 %v1211_v0  ;;  %1150 = vmatpush3.msra.mxu0 %v1367_v45 }
  0x2a   :  { %1151 = vmatprep.mubr.msk.f32.mxu0 %vm1212_vm1, %v1211_v0  ;;  %1155 = vmatpush3.msra.mxu1 %v631_v56 }
  0x2b   :  { %1152 = vmatmul.mubr.f32.vlgmr.msra.gmra.mxu0 %v596_v57  ;;  %1156 = vmatprep.subr.mxu1 %v1211_v0 }
  0x2c   :  { %1165 = vmatprep.subr.mxu0 %v1211_v0  ;;  %1157 = vmatpush3.msra.mxu1 %v638_v59 }
  0x2d   :  { %1166 = vmatpush3.msra.mxu0 %v1352_v41  ;;  %1158 = vmatprep.subr.mxu1 %v1211_v0 }
  0x2e   :  { %1167 = vmatprep.subr.mxu0 %v1211_v0  ;;  %1159 = vmatpush3.msra.mxu1 %v645_v61 }
  0x2f   :  { %1168 = vmatpush3.msra.mxu0 %v1365_v44  ;;  %1160 = vmatprep.subr.mxu1 %v1211_v0 }
  0x30   :  { %1169 = vmatprep.subr.mxu0 %v1211_v0  ;;  %1161 = vmatpush3.msra.mxu1 %v652_v62 }
  0x31   :  { %1162 = vmatprep.mubr.msk.f32.mxu1 %vm1212_vm1, %v1211_v0  ;;  %1170 = vmatpush3.msra.mxu0 %v1374_v46 }
  0x32   :  { %1163 = vmatmul.mubr.f32.vlgmr.msra.gmra.mxu1 %v1331_v36  ;;  %1171 = vmatprep.subr.mxu0 %v1211_v0 }
  0x33   :  { %1176 = vmatprep.subr.mxu1 %v1211_v0  ;;  %1172 = vmatpush3.msra.mxu0 %v1385_v49 }
  0x34   :  { %1173 = vmatprep.mubr.msk.f32.mxu0 %vm1212_vm1, %v1211_v0  ;;  %1177 = vmatpush3.msra.mxu1 %v1335_v37 }
  0x35   :  { %1174 = vmatmul.mubr.f32.vlgmr.msra.gmra.mxu0 %v1357_v43  ;;  %1178 = vmatprep.subr.mxu1 %v1211_v0 }
  0x36   :  { %1187 = vmatprep.subr.mxu0 %v1211_v0  ;;  %1179 = vmatpush3.msra.mxu1 %v1343_v39 }
  0x37   :  { %1188 = vmatpush3.msra.mxu0 %v629_v47  ;;  %1180 = vmatprep.subr.mxu1 %v1211_v0 }
  0x38   :  { %1189 = vmatprep.subr.mxu0 %v1211_v0  ;;  %1181 = vmatpush3.msra.mxu1 %v1354_v42 }
  0x39   :  { %1190 = vmatpush3.msra.mxu0 %v636_v50  ;;  %1182 = vmatprep.subr.mxu1 %v1211_v0 }
  0x3a   :  { %1191 = vmatprep.subr.mxu0 %v1211_v0  ;;  %1183 = vmatpush3.msra.mxu1 %v1367_v45 }
  0x3b   :  { %1184 = vmatprep.mubr.msk.f32.mxu1 %vm1212_vm1, %v1211_v0  ;;  %1192 = vmatpush3.msra.mxu0 %v643_v53 }
  0x3c   :  { %1185 = vmatmul.mubr.f32.vlgmr.msra.gmra.mxu1 %v594_v48  ;;  %1193 = vmatprep.subr.mxu0 %v1211_v0 }
  0x3d   :  { %1198 = vmatprep.subr.mxu1 %v1211_v0  ;;  %1194 = vmatpush3.msra.mxu0 %v650_v55 }
  0x3e   :  { %1195 = vmatprep.mubr.msk.f32.mxu0 %vm1212_vm1, %v1211_v0  ;;  %1199 = vmatpush3.msra.mxu1 %v1335_v37 }
  0x3f   :  { %1196 = vmatmul.mubr.f32.vlgmr.msra.gmra.mxu0 %v1331_v36  ;;  %1200 = vmatprep.subr.mxu1 %v1211_v0 }
  0x40   :  { %1206 = vmatprep.mubr.msk.f32.mxu1 %vm1212_vm1, %v1211_v0  ;;  %1201 = vmatpush3.msra.mxu1 %v1343_v39 }
  0x41   :  { %1202 = vmatprep.subr.mxu1 %v1211_v0 }
  0x42   :  { %1203 = vmatpush3.msra.mxu1 %v1354_v42 }
  0x43   :  { %1204 = vmatprep.subr.mxu1 %v1211_v0 }
  0x44   :  { %1205 = vmatpush3.msra.mxu1 %v1367_v45 }
  0x45   :  { %1207 = vmatmul.mubr.f32.vlgmr.msra.gmra.mxu1 %v1331_v36 }
  0xcf   :  { %v110_v63 = vpop.f32.mrf.mxu0 }
  0xd1   :  { %v1087_v1 = vpop.f32.mrf.mxu0 }
  0xd3   :  { %v201_v2 = vpop.f32.mrf.mxu1 }
  0xd4   :  { %v202_v11 = vadd.f32 %v201_v2, %v110_v63 }
  0xd5   :  { %v1098_v3 = vpop.f32.mrf.mxu1 }
  0xd7   :  { %v281_v4 = vpop.f32.mrf.mxu0 }
  0xd8   :  { %v282_v14 = vadd.f32 %v281_v4, %v202_v11 }
  0xd9   :  { %v1109_v5 = vpop.f32.mrf.mxu0 }
  0xde   :  { %v358_v6 = vpop.f32.mrf.mxu1 }
  0xdf   :  { %v359_v15 = vadd.f32 %v358_v6, %v282_v14 }
  0xe0   :  { %v1120_v7 = vpop.f32.mrf.mxu1 }
  0xe1   :  { %v441_v8 = vpop.f32.mrf.mxu0 }
  0xe2   :  { %v442_v17 = vadd.f32 %v441_v8, %v359_v15 }
  0xe3   :  { %v1131_v9 = vpop.f32.mrf.mxu0 }
  0xe8   :  { %v516_v10 = vpop.f32.mrf.mxu1 }
  0xe9   :  { %v517_v19 = vadd.f32 %v516_v10, %v442_v17 }
  0xea   :  { %v1142_v12 = vpop.f32.mrf.mxu1 }
  0xeb   :  { %v598_v13 = vpop.f32.mrf.mxu0 }
  0xec   :  { %v599_v22 = vadd.f32 %v598_v13, %v517_v19 }
  0xed   :  { %v1153_v0 = vpop.f32.mrf.mxu0 }
  0xf2   :  { %v689_v16 = vpop.f32.mrf.mxu1 }
  0xf3   :  { %v690_v23 = vadd.f32 %v689_v16, %v599_v22 }
  0xf4   :  { %v1164_v18 = vpop.f32.mrf.mxu1 }
  0xf5   :  { %v769_v20 = vpop.f32.mrf.mxu0 }
  0xf6   :  { %v770_v26 = vadd.f32 %v769_v20, %v690_v23 }
  0xf7   :  { %v1175_v21 = vpop.f32.mrf.mxu0 }
  0xfc   :  { %v846_v24 = vpop.f32.mrf.mxu1 }
  0xfd   :  { %v847_v28 = vadd.f32 %v846_v24, %v770_v26 }
  0xfe   :  { %v1186_v25 = vpop.f32.mrf.mxu1 }
  0xff   :  { %v929_v27 = vpop.f32.mrf.mxu0 }
 0x100   :  { %v930_v30 = vadd.f32 %v929_v27, %v847_v28 }
 0x101   :  { %v1197_v29 = vpop.f32.mrf.mxu0 }
 0x105   :  { %v1004_v31 = vpop.f32.mrf.mxu1 }
 0x106   :  { %v1005_v33 = vadd.f32 %v1004_v31, %v930_v30 }
 0x107   :  { %v1208_v34 = vpop.f32.mrf.mxu1 }
 0x108   :  { %v1010_v35 = vadd.f32 %v1009_v32, %v1005_v33 }
 0x10a   :  { %1012 = vst.msk [vmem:[%s1475_s5] sm:$0xff] %vm1011_vm2, %v1010_v35 }

</bundles_post_ra>
